<compile_context>
chip_gen: v6e
topology: v6e:2x2x1
jax: 0.10.0
libtpu: 0.0.40
codegen_flags: <defaults>
</compile_context>

<pallas_src>
import functools

import jax
import jax.numpy as jnp
from jax.experimental import pallas as pl
from jax.experimental.pallas import tpu as pltpu

_LANES = 128


def _wce_elementwise(x, y, positive_weight):
    """Numerically-stable BCE-with-logits + positive weighting, computed in f32."""
    x = x.astype(jnp.float32)
    y = y.astype(jnp.float32)
    # loss = max(x, 0) - x*y + log1p(exp(-|x|))
    bce = jnp.maximum(x, 0.0) - x * y + jnp.log1p(jnp.exp(-jnp.abs(x)))
    # weight = 1 where y == 0, positive_weight where y == 1 (hard labels).
    w = 1.0 + (jnp.float32(positive_weight) - 1.0) * y
    return bce * w


def _wce_sum_kernel(pred_ref, tgt_ref, out_ref, *, positive_weight, n_valid,
                    tile_rows, tiles_per_partial, needs_mask):
    p = pl.program_id(0)          # 'parallel' partial-sum slice (megacore split)
    t = pl.program_id(1)          # 'arbitrary' reduction step within the slice

    loss = _wce_elementwise(pred_ref[...], tgt_ref[...], positive_weight)

    if needs_mask:
        # Zero out padded elements so mean/sum use the true N.
        tile_idx = p * tiles_per_partial + t
        base = tile_idx * (tile_rows * _LANES)
        row = jax.lax.broadcasted_iota(jnp.int32, (tile_rows, _LANES), 0)
        lane = jax.lax.broadcasted_iota(jnp.int32, (tile_rows, _LANES), 1)
        flat = base + row * _LANES + lane
        loss = jnp.where(flat < n_valid, loss, 0.0)

    @pl.when(t == 0)
    def _():
        out_ref[...] = jnp.zeros_like(out_ref)

    # Reduce (tile_rows, 128) -> (8, 128) with pure VPU adds (no cross-lane
    # movement); the final scalar reduce happens once, outside the kernel.
    out_ref[...] += loss.reshape(tile_rows // 8, 8, _LANES).sum(axis=0)


def _wce_none_kernel(pred_ref, tgt_ref, out_ref, *, positive_weight):
    out_ref[...] = _wce_elementwise(pred_ref[...], tgt_ref[...], positive_weight)


def binary_wce_loss(predict, target, positive_weight=5.0, reduction="mean",
                    tile_rows=512):
    """Pallas implementation of BinaryWCELoss.forward."""
    if reduction not in ("mean", "sum", "none"):
        raise Exception("Unexpected reduction {}".format(reduction))
    assert predict.shape == target.shape
    orig_shape = predict.shape
    n = int(predict.size)

    # Lane-dense layout: flatten to (rows, 128); rows padded up to a multiple
    # of the tile height (itself a multiple of the 8 sublanes).
    rows_needed = max(1, -(-n // _LANES))
    tr = max(8, min(int(tile_rows), -(-rows_needed // 8) * 8))
    tr = (tr // 8) * 8
    num_tiles = -(-rows_needed // tr)

    if reduction == "none":
        n_partials, tiles_per_partial = 1, num_tiles
    else:
        n_partials = 2 if num_tiles >= 2 else 1
        tiles_per_partial = -(-num_tiles // n_partials)
    total_tiles = n_partials * tiles_per_partial
    padded_rows = total_tiles * tr
    total = padded_rows * _LANES

    p_flat = jnp.ravel(predict)          # native dtype: cast happens in-kernel
    t_flat = jnp.ravel(target)
    if total > n:
        p_flat = jnp.pad(p_flat, (0, total - n))
        t_flat = jnp.pad(t_flat, (0, total - n))
    p2 = p_flat.reshape(padded_rows, _LANES)
    t2 = t_flat.reshape(padded_rows, _LANES)

    in_bytes = n * (jnp.dtype(predict.dtype).itemsize
                    + jnp.dtype(target.dtype).itemsize)

    if reduction == "none":
        cost = pl.CostEstimate(flops=8 * n, transcendentals=2 * n,
                               bytes_accessed=in_bytes + 4 * n)
        loss = pl.pallas_call(
            functools.partial(_wce_none_kernel,
                              positive_weight=float(positive_weight)),
            out_shape=jax.ShapeDtypeStruct((padded_rows, _LANES), jnp.float32),
            grid_spec=pltpu.PrefetchScalarGridSpec(
                num_scalar_prefetch=0,
                grid=(num_tiles,),
                in_specs=[pl.BlockSpec((tr, _LANES), lambda i: (i, 0)),
                          pl.BlockSpec((tr, _LANES), lambda i: (i, 0))],
                out_specs=pl.BlockSpec((tr, _LANES), lambda i: (i, 0)),
            ),
            compiler_params=pltpu.CompilerParams(
                dimension_semantics=("parallel",)),
            cost_estimate=cost,
        )(p2, t2)
        return loss.reshape(-1)[:n].reshape(orig_shape)

    # 'mean' / 'sum': accumulate per-lane partial sums per 'parallel' slice.
    cost = pl.CostEstimate(flops=8 * n, transcendentals=2 * n,
                           bytes_accessed=in_bytes + n_partials * 8 * _LANES * 4)
    partials = pl.pallas_call(
        functools.partial(_wce_sum_kernel,
                          positive_weight=float(positive_weight),
                          n_valid=n, tile_rows=tr,
                          tiles_per_partial=tiles_per_partial,
                          needs_mask=(total != n)),
        out_shape=jax.ShapeDtypeStruct((n_partials * 8, _LANES), jnp.float32),
        grid_spec=pltpu.PrefetchScalarGridSpec(
            num_scalar_prefetch=0,
            grid=(n_partials, tiles_per_partial),
            in_specs=[
                pl.BlockSpec((tr, _LANES),
                             lambda p, t: (p * tiles_per_partial + t, 0)),
                pl.BlockSpec((tr, _LANES),
                             lambda p, t: (p * tiles_per_partial + t, 0)),
            ],
            out_specs=pl.BlockSpec((8, _LANES), lambda p, t: (p, 0)),
        ),
        compiler_params=pltpu.CompilerParams(
            dimension_semantics=("parallel", "arbitrary")),
        cost_estimate=cost,
    )(p2, t2)

    total_sum = jnp.sum(partials)        # tiny (<=2048 elem) final reduce in XLA
    if reduction == "mean":
        return total_sum / jnp.float32(n)
    return total_sum


def _reference(predict, target, positive_weight=5.0, reduction="mean"):
    x = predict.astype(jnp.float32)
    y = target.astype(jnp.float32)
    bce = jnp.maximum(x, 0.0) - x * y + jnp.log1p(jnp.exp(-jnp.abs(x)))
    w = jnp.where(y == 1.0, jnp.float32(positive_weight), jnp.float32(1.0))
    loss = bce * w
    if reduction == "mean":
        return loss.mean()
    if reduction == "sum":
        return loss.sum()
    return loss


if __name__ == "__main__":
    key = jax.random.PRNGKey(0)
    k_pred, k_tgt = jax.random.split(key)

    # (N, 1) shapes consistent with the module's contract.
    N = 16
    predict = jax.random.normal(k_pred, (N, 1), dtype=jnp.float32)
    target = jax.random.bernoulli(k_tgt, p=0.3, shape=(N, 1)).astype(jnp.float32)

    checks = []
    for reduction in ("mean", "sum", "none"):
        out = jax.block_until_ready(
            binary_wce_loss(predict, target, positive_weight=5.0,
                            reduction=reduction))
        ref = _reference(predict, target, positive_weight=5.0,
                         reduction=reduction)
        checks.append(bool(jnp.allclose(out, ref, rtol=1e-4, atol=1e-5)))

    # Larger case exercising the multi-tile grid, 2-way partial sums and the
    # padding mask (small tile so each partial runs >1 reduction step).
    N2 = 4000
    k1, k2 = jax.random.split(jax.random.PRNGKey(1))
    predict2 = jax.random.normal(k1, (N2, 1), dtype=jnp.float32)
    target2 = jax.random.bernoulli(k2, p=0.3, shape=(N2, 1)).astype(jnp.float32)
    out2 = jax.block_until_ready(
        binary_wce_loss(predict2, target2, positive_weight=5.0,
                        reduction="mean", tile_rows=8))
    ref2 = _reference(predict2, target2, positive_weight=5.0, reduction="mean")
    checks.append(bool(jnp.allclose(out2, ref2, rtol=1e-4, atol=1e-5)))

    # Native bf16 logits passed straight through (upcast happens in-kernel).
    out3 = jax.block_until_ready(
        binary_wce_loss(predict.astype(jnp.bfloat16), target,
                        positive_weight=5.0, reduction="mean"))
    ref3 = _reference(predict.astype(jnp.bfloat16), target,
                      positive_weight=5.0, reduction="mean")
    checks.append(bool(jnp.allclose(out3, ref3, rtol=1e-4, atol=1e-5)))

    assert all(checks), checks
    print("KERNEL_OK")
</pallas_src>

<mosaic_0001>
module attributes {stable_mosaic.version = 11 : i64} {
  func.func @_wce_sum_kernel(%arg0: i32, %arg1: i32, %arg2: memref<8x128xf32, #tpu.memory_space<vmem>>, %arg3: memref<8x128xf32, #tpu.memory_space<vmem>>, %arg4: memref<8x128xf32, #tpu.memory_space<vmem>>) attributes {dimension_semantics = [#tpu.dimension_semantics<parallel>, #tpu.dimension_semantics<arbitrary>], iteration_bounds = array<i64: 1, 1>, scalar_prefetch = 0 : i64, scratch_operands = 0 : i64, tpu.core_type = #tpu.core_type<tc>, window_params = [{transform_indices = @transform_0, window_bounds = array<i64: 8, 128>}, {transform_indices = @transform_1, window_bounds = array<i64: 8, 128>}, {transform_indices = @transform_2, window_bounds = array<i64: 8, 128>}]} {
    %c0 = arith.constant 0 : index
    %c0_0 = arith.constant 0 : index
    %0 = vector.load %arg2[%c0, %c0_0] : memref<8x128xf32, #tpu.memory_space<vmem>>, vector<8x128xf32>
    %c0_1 = arith.constant 0 : index
    %c0_2 = arith.constant 0 : index
    %1 = vector.load %arg3[%c0_1, %c0_2] : memref<8x128xf32, #tpu.memory_space<vmem>>, vector<8x128xf32>
    %cst = arith.constant 0.000000e+00 : f32
    %2 = vector.broadcast %cst : f32 to vector<8x128xf32>
    %3 = arith.maximumf %0, %2 : vector<8x128xf32>
    %4 = arith.mulf %0, %1 : vector<8x128xf32>
    %5 = arith.subf %3, %4 : vector<8x128xf32>
    %6 = math.absf %0 : vector<8x128xf32>
    %cst_3 = arith.constant 0.000000e+00 : f32
    %7 = vector.broadcast %cst_3 : f32 to vector<8x128xf32>
    %8 = arith.subf %7, %6 : vector<8x128xf32>
    %9 = math.exp %8 : vector<8x128xf32>
    %10 = math.log1p %9 : vector<8x128xf32>
    %11 = arith.addf %5, %10 : vector<8x128xf32>
    %cst_4 = arith.constant 5.000000e+00 : f32
    %cst_5 = arith.constant 1.000000e+00 : f32
    %12 = arith.subf %cst_4, %cst_5 : f32
    %13 = vector.broadcast %12 : f32 to vector<8x128xf32>
    %14 = arith.mulf %13, %1 : vector<8x128xf32>
    %cst_6 = arith.constant 1.000000e+00 : f32
    %15 = vector.broadcast %cst_6 : f32 to vector<8x128xf32>
    %16 = arith.addf %15, %14 : vector<8x128xf32>
    %17 = arith.mulf %11, %16 : vector<8x128xf32>
    %c1_i32 = arith.constant 1 : i32
    %18 = arith.muli %arg0, %c1_i32 : i32
    %19 = arith.addi %18, %arg1 : i32
    %c1024_i32 = arith.constant 1024 : i32
    %20 = arith.muli %19, %c1024_i32 : i32
    %21 = tpu.iota {dimensions = array<i32: 0>} : vector<8x128xi32>
    %22 = tpu.iota {dimensions = array<i32: 1>} : vector<8x128xi32>
    %c128_i32 = arith.constant 128 : i32
    %23 = vector.broadcast %c128_i32 : i32 to vector<8x128xi32>
    %24 = arith.muli %21, %23 : vector<8x128xi32>
    %25 = vector.broadcast %20 : i32 to vector<8x128xi32>
    %26 = arith.addi %25, %24 : vector<8x128xi32>
    %27 = arith.addi %26, %22 : vector<8x128xi32>
    %c16_i32 = arith.constant 16 : i32
    %28 = vector.broadcast %c16_i32 : i32 to vector<8x128xi32>
    %29 = arith.cmpi slt, %27, %28 : vector<8x128xi32>
    %cst_7 = arith.constant 0.000000e+00 : f32
    %30 = vector.broadcast %cst_7 : f32 to vector<8x128xf32>
    %31 = arith.select %29, %17, %30 : vector<8x128xi1>, vector<8x128xf32>
    %c0_i32 = arith.constant 0 : i32
    %32 = arith.cmpi eq, %arg1, %c0_i32 : i32
    %33 = arith.extui %32 : i1 to i32
    %c0_i32_8 = arith.constant 0 : i32
    %34 = arith.cmpi ne, %33, %c0_i32_8 : i32
    scf.if %34 {
      %cst_14 = arith.constant 0.000000e+00 : f32
      %40 = vector.broadcast %cst_14 : f32 to vector<8x128xf32>
      %c0_15 = arith.constant 0 : index
      %c0_16 = arith.constant 0 : index
      %41 = vector.load %arg4[%c0_15, %c0_16] : memref<8x128xf32, #tpu.memory_space<vmem>>, vector<8x128xf32>
      tpu.vector_store %arg4[%c0_15, %c0_16], %40 {strides = array<i32>} : memref<8x128xf32, #tpu.memory_space<vmem>>, vector<8x128xf32>,
    } else {
    }
    %c0_9 = arith.constant 0 : index
    %c0_10 = arith.constant 0 : index
    %35 = vector.load %arg4[%c0_9, %c0_10] : memref<8x128xf32, #tpu.memory_space<vmem>>, vector<8x128xf32>
    %36 = vector.shape_cast %31 : vector<8x128xf32> to vector<1x8x128xf32>
    %cst_11 = arith.constant dense<0.000000e+00> : vector<8x128xf32>
    %37 = vector.multi_reduction <add>, %36, %cst_11 [0] : vector<1x8x128xf32> to vector<8x128xf32>
    %38 = arith.addf %35, %37 : vector<8x128xf32>
    %c0_12 = arith.constant 0 : index
    %c0_13 = arith.constant 0 : index
    %39 = vector.load %arg4[%c0_12, %c0_13] : memref<8x128xf32, #tpu.memory_space<vmem>>, vector<8x128xf32>
    tpu.vector_store %arg4[%c0_12, %c0_13], %38 {strides = array<i32>} : memref<8x128xf32, #tpu.memory_space<vmem>>, vector<8x128xf32>,
    return
  }
  func.func @transform_0(%arg0: i32, %arg1: i32) -> (i32, i32) {
    %c1_i32 = arith.constant 1 : i32
    %0 = arith.muli %arg0, %c1_i32 : i32
    %1 = arith.addi %0, %arg1 : i32
    %c0_i32 = arith.constant 0 : i32
    %c0_i32_0 = arith.constant 0 : i32
    return %1, %c0_i32 : i32, i32
  }
  func.func @transform_1(%arg0: i32, %arg1: i32) -> (i32, i32) {
    %c1_i32 = arith.constant 1 : i32
    %0 = arith.muli %arg0, %c1_i32 : i32
    %1 = arith.addi %0, %arg1 : i32
    %c0_i32 = arith.constant 0 : i32
    %c0_i32_0 = arith.constant 0 : i32
    return %1, %c0_i32 : i32, i32
  }
  func.func @transform_2(%arg0: i32, %arg1: i32) -> (i32, i32) {
    %c0_i32 = arith.constant 0 : i32
    %c0_i32_0 = arith.constant 0 : i32
    return %arg0, %c0_i32 : i32, i32
  }
}

</mosaic_0001>

<bundles_post_ra>
// kernel: tpu_custom_call.1
= control target key start
LH: loop header
LB: loop body
LE: loop exit
PB: predicated region body
PF: predicated region fallthrough
CT: control target
= control target key end

     0   :  { %7 = vsyncpa [#allocation3], 0  ;;  %s204_s0 = inlined_call_operand.hbm [shape: f32[8,128], index: 0, kind: input, shape index: {}]   ;;  %s205_s1 = inlined_call_operand.hbm [shape: f32[8,128], index: 1, kind: input, shape index: {}]   ;;  %s206_s2 = inlined_call_operand.hbm [shape: f32[8,128], index: 2, kind: output, shape index: {}]  }
   0x1   :  { %8 = vsyncpa [#allocation6], 0 }
   0x2   :  { %9 = vsyncpa [#allocation4], 0  ;;  %s177_s9 = smov [#allocation2]   ;;  %s178_s11 = smov [#allocation5]  }
   0x3   :  { %s19_s10 = sshll.u32 %s177_s9, 4  ;;  %s32_s12 = sshll.u32 %s178_s11, 4  ;;  %s20_s10 = int_to_ptr.vmem [resolvable:$true] %s19_s10  ;;  %s33_s12 = int_to_ptr.vmem [resolvable:$true] %s32_s12 }
   0x4   :  { %s119_s13 = scalar_lea.vmem %s20_s10, 128  ;;  %p124_p1 = scmp.lt.s32.totalorder %s20_s10, %s20_s10 }
   0x5   :  { %p120_p0 = scmp.ne.s32.totalorder %s20_s10, %s119_s13  ;;  %p125_p2 = scmp.lt.s32.totalorder %s119_s13, %s119_s13 }
   0x7   :  { %p126_p3 = por %p125_p2, %p124_p1 }
   0x9   :  { %p127_p4 = pnand %p126_p3, %p120_p0 }
   0xb   :  { %130 = shalt.err (!%p127_p4)
}
   0xc   :  { %22 = dma.hbm_to_vmem [thread:$0]  %s204_s0, 128, %s20_s10, [#allocation3]  }
   0xd   :  { %s139_s16 = scalar_lea.vmem %s33_s12, 128  ;;  %p144_p6 = scmp.lt.s32.totalorder %s33_s12, %s33_s12 }
   0xe   :  { %p140_p5 = scmp.ne.s32.totalorder %s33_s12, %s139_s16  ;;  %p145_p7 = scmp.lt.s32.totalorder %s139_s16, %s139_s16 }
  0x10   :  { %p146_p8 = por %p145_p7, %p144_p6 }
  0x12   :  { %p147_p9 = pnand %p146_p8, %p140_p5 }
  0x14   :  { %150 = shalt.err (!%p147_p9)
}
  0x15   :  { %35 = dma.hbm_to_vmem [thread:$0]  %s205_s1, 128, %s33_s12, [#allocation6]  }
  0x16   :  { %171 = dma.done.wait [#allocation3], 128  }
  0x17   :  { %172 = vsyncadd [#allocation3], 4294967168 }
  0x18   :  { %173 = dma.done.wait [#allocation6], 128  }
  0x19   :  { %174 = vsyncadd [#allocation6], 4294967168  ;;  %v44_v0 = vld [vmem:[#allocation2] sm:$0xff]  ;;  %v68_v6 = vlaneseq  ;;  %v45_v8 = vld [vmem:[#allocation5] sm:$0xff]  ;;  %s179_s0 = smov [#allocation7]  }
  0x1a   :  { %v49_v1 = vand.u32 2147483647, %v44_v0  ;;  %v46_v11 = vmax.f32 %v44_v0, 0.0  ;;  %v47_v12 = vmul.f32 %v45_v8, %v44_v0  ;;  %v63_v16 = vmul.f32 4.0, %v45_v8  ;;  %s93_s1 = sshll.u32 %s179_s0, 4  ;;  %s94_s1 = int_to_ptr.vmem [resolvable:$true] %s93_s1 }
  0x1b   :  { %v69_v9 = vshrl.u32 %v68_v6, 7  ;;  %v71_v14 = vand.u32 127, %v68_v6  ;;  %s151_s19 = scalar_lea.vmem %s94_s1, 128  ;;  %p156_p11 = scmp.lt.s32.totalorder %s94_s1, %s94_s1 }
  0x1c   :  { %v50_v2 = vsub.f32 0.0, %v49_v1  ;;  %v48_v19 = vsub.f32 %v46_v11, %v47_v12  ;;  %v64_v22 = vadd.f32 1.0, %v63_v16  ;;  %p152_p10 = scmp.ne.s32.totalorder %s94_s1, %s151_s19  ;;  %p157_p12 = scmp.lt.s32.totalorder %s151_s19, %s151_s19 }
  0x1d   :  { %v72_v15 = vmul.u32 128, %v69_v9 }
  0x1e   :  { %v51_v3 = vmul.f32 1.442695, %v50_v2  ;;  %p158_p13 = por %p157_p12, %p156_p11 }
  0x1f   :  { %v75_v21 = vadd.s32 %v72_v15, %v71_v14 }
  0x20   :  { %107 = vpow2.f32 %v51_v3  ;;  %p159_p0 = pnand %p158_p13, %p152_p10 }
  0x21   :  { %vm76_vm1 = vcmp.lt.s32.totalorder %v75_v21, 16 }
  0x2d   :  { %v108_v4 = vpop.eup %107 }
  0x2e   :  { %v53_v5 = vadd.f32 1.0, %v108_v4  ;;  %v56_v7 = vmul.f32 -0.5, %v108_v4  ;;  %v59_v13 = vand.u32 2147483647, %v108_v4 }
  0x30   :  { %109 = vlog2.f32 %v53_v5  ;;  %v57_v10 = vadd.f32 1.0, %v56_v7  ;;  %vm60_vm0 = vcmp.lt.f32.partialorder %v59_v13, 0.0004427343 }
  0x32   :  { %v58_v17 = vmul.f32 %v108_v4, %v57_v10 }
  0x3d   :  { %v110_v18 = vpop.eup %109 }
  0x3e   :  { %v55_v20 = vmul.f32 0.6931472, %v110_v18 }
  0x40   :  { %v61_v23 = vsel %vm60_vm0, %v58_v17, %v55_v20 }
  0x41   :  { %v62_v24 = vadd.f32 %v61_v23, %v48_v19 }
  0x43   :  { %v65_v25 = vmul.f32 %v64_v22, %v62_v24 }
  0x45   :  { %v77_v26 = vsel %vm76_vm1, %v65_v25, 0.0 }
  0x46   :  { %86 = vst [vmem:[#allocation7] sm:$0xff] %v77_v26 }
  0x47   :  { %162 = shalt.err (!%p159_p0)
}
  0x48   :  { %96 = dma.vmem_to_hbm [thread:$0]  %s94_s1, 128, %s206_s2, [#allocation4]  }
  0x49   :  { %175 = dma.done.wait [#allocation4], 128  }
  0x4a   :  { %176 = vsyncadd [#allocation4], 4294967168 }
  0x4b   :  { %100 = vsyncpa [#allocation3], 1 }
  0x4c   :  { %101 = vsyncpa [#allocation6], 1 }
  0x4d   :  { %102 = vsyncpa [#allocation4], 1 }

</bundles_post_ra>
